<compile_context>
chip_gen: v5e
topology: v5e:2x2
jax: 0.10.0
libtpu: 0.0.40
codegen_flags: <defaults>
</compile_context>

<pallas_src>
import math

import jax
import jax.numpy as jnp
from jax import lax
from jax.experimental import pallas as pl
from jax.experimental.pallas import tpu as pltpu


def _round_up(x, m):
    return -(-x // m) * m


# --------------------------------------------------------------------------
# Pallas kernel: patch projection (conv-as-matmul) + fused pos + bias add
# --------------------------------------------------------------------------
def _patch_project_kernel(x_ref, w_ref, pos_ref, b_ref, o_ref):
    acc = jnp.dot(x_ref[...], w_ref[...], preferred_element_type=jnp.float32)
    acc = acc + pos_ref[...].astype(jnp.float32) + b_ref[...].astype(jnp.float32)
    o_ref[...] = acc.astype(o_ref.dtype)


def patch_project(x_flat, w_kh, pos_flat, bias, *, tm=512, out_dtype=jnp.bfloat16):
    """out = x_flat @ w_kh + pos_flat + bias, f32 MXU accumulation.

    x_flat: (M, K) ; w_kh: (K, H) ; pos_flat: (M, H) ; bias: (H,).
    x/w/pos are streamed as bf16, bias stays f32, output is `out_dtype`.
    """
    M, K = x_flat.shape
    Kw, H = w_kh.shape
    assert Kw == K and pos_flat.shape == (M, H) and bias.shape == (H,)

    # Lane-dense hidden dim (no-op for production H = 768/1152; only toy H pads).
    H_pad = _round_up(H, 128)
    if H_pad != H:
        w_kh = jnp.pad(w_kh, ((0, 0), (0, H_pad - H)))
        pos_flat = jnp.pad(pos_flat, ((0, 0), (0, H_pad - H)))
        bias = jnp.pad(bias, ((0, H_pad - H),))
    bias2d = bias.astype(jnp.float32).reshape(1, H_pad)

    # bf16 input streams; MXU accumulates in f32 inside the kernel.
    x_flat = x_flat.astype(jnp.bfloat16)
    w_kh = w_kh.astype(jnp.bfloat16)
    pos_flat = pos_flat.astype(jnp.bfloat16)
    # K stays un-padded: the x block's last dim equals the full array dim, which
    # is legal; padding K would add a full (M, K) copy pass for a ~few % gain.

    # M tile: 512 by default (~85% of HBM roofline, enough grid steps for v7x's
    # two TCs).  Prefer a divisor of M in [tm/2, tm] so the last tile is not
    # ragged; otherwise rely on Pallas boundary masking (no wrapper pad/slice).
    tm = max(8, (tm // 8) * 8)
    if M <= tm:
        tm_eff = M
    else:
        tm_eff = tm
        for d in range(tm, tm // 2 - 1, -8):
            if M % d == 0:
                tm_eff = d
                break
    grid_m = pl.cdiv(M, tm_eff)

    ob = jnp.dtype(out_dtype).itemsize
    vmem_bytes = (2 * K * H_pad * 2          # resident weight (double-buffered), bf16
                  + 2 * tm_eff * K * 2       # streamed x tiles, bf16
                  + 2 * tm_eff * H_pad * 2   # streamed pos tiles, bf16
                  + 2 * H_pad * 4            # bias (f32)
                  + 2 * tm_eff * H_pad * ob  # output tiles
                  + (4 << 20))               # headroom for Mosaic internal scratch
    # Never request all of v7x's 64 MiB physical VMEM; floor at v5e's default.
    vmem_limit = int(min(max(vmem_bytes, 16 << 20), 48 << 20))

    out = pl.pallas_call(
        _patch_project_kernel,
        out_shape=jax.ShapeDtypeStruct((M, H_pad), out_dtype),
        grid_spec=pltpu.PrefetchScalarGridSpec(
            num_scalar_prefetch=0,
            grid=(grid_m,),
            in_specs=[
                pl.BlockSpec((tm_eff, K), lambda i: (i, 0)),
                pl.BlockSpec((K, H_pad), lambda i: (0, 0)),
                pl.BlockSpec((tm_eff, H_pad), lambda i: (i, 0)),
                pl.BlockSpec((1, H_pad), lambda i: (0, 0)),
            ],
            out_specs=pl.BlockSpec((tm_eff, H_pad), lambda i: (i, 0)),
        ),
        compiler_params=pltpu.CompilerParams(
            dimension_semantics=("parallel",),   # lets v7x shard M over its 2 TCs
            vmem_limit_bytes=vmem_limit,
        ),
    )(x_flat, w_kh, pos_flat, bias2d)

    if H_pad != H:
        out = out[:, :H]
    return out


# --------------------------------------------------------------------------
# Bicubic sampling helpers (plain JAX, expressed as small one-hot matmuls)
# --------------------------------------------------------------------------
# TODO(synk): the sampling/pos-interp one-hot matmuls below stay in plain JAX
# (XLA dots); they are small after the separable rewrite but could be fused
# into a Pallas kernel if they ever show up in profiles.
_CUBIC_A = -0.75


def _cubic_weights(t):
    A = _CUBIC_A

    def c1(x):  # |x| <= 1
        return ((A + 2.0) * x - (A + 3.0)) * x * x + 1.0

    def c2(x):  # 1 < |x| < 2
        return ((A * x - 5.0 * A) * x + 8.0 * A) * x - 4.0 * A

    return (c2(t + 1.0), c1(t), c1(1.0 - t), c2(2.0 - t))


def _axis_tap_weights(coord, size):
    """coord: (...,) grid_sample normalized coords (align_corners=False).
    Returns (..., size) f32 bicubic tap-weight rows.  Out-of-bounds taps match
    no column and contribute zero — exactly padding_mode='zeros'."""
    pix = ((coord.astype(jnp.float32) + 1.0) * size - 1.0) * 0.5
    base = jnp.floor(pix)
    w4 = _cubic_weights(pix - base)
    base_i = base.astype(jnp.int32)
    cols = lax.broadcasted_iota(jnp.int32, coord.shape + (size,), coord.ndim)
    out = jnp.zeros(coord.shape + (size,), jnp.float32)
    for t in range(4):
        idx = (base_i + (t - 1))[..., None]
        out = out + jnp.where(cols == idx, w4[t][..., None], 0.0)
    return out


def sample_patches_bicubic(inp, sample_grid):
    """Equivalent of torch.vmap(F.grid_sample)(inp, flip(sample_grid, -1),
    mode='bicubic', padding_mode='zeros', align_corners=False) over the patch
    axis.  The per-patch affine is diagonal, so the grid-sample x coordinate
    depends only on the second patch axis and y only on the first -> exact
    separable per-axis sampling.
    inp: (N, C, Himg, Wimg); sample_grid: (N, M, P, P, 2) (comp 0 -> y, 1 -> x).
    Returns (N, M, C, P, P) float32.
    """
    N, C, Himg, Wimg = inp.shape
    x = sample_grid[:, :, 0, :, 1]            # (N, M, P)  depends only on pw
    y = sample_grid[:, :, :, 0, 0]            # (N, M, P)  depends only on ph
    Wx = _axis_tap_weights(x, Wimg)           # (N, M, P, Wimg)
    Wy = _axis_tap_weights(y, Himg)           # (N, M, P, Himg)
    inp32 = inp.astype(jnp.float32)
    tmp = jnp.einsum('nchw,nmjw->nmchj', inp32, Wx)      # (N, M, C, Himg, P)
    out = jnp.einsum('nmih,nmchj->nmcij', Wy, tmp)       # (N, M, C, P, P)
    return out


def make_patch_points(patch_size):
    c = 1.0 / patch_size
    lin = jnp.linspace(-1.0 + c, 1.0 - c, patch_size)
    gx, gy = jnp.meshgrid(lin, lin, indexing="ij")
    return jnp.stack((gx, gy, jnp.ones((patch_size, patch_size))), axis=-1)  # (P,P,3)


def grid_sample_points(patch_config, grid_size, patch_points):
    l = jnp.linspace(1.0, 0.0, grid_size + 1)
    g_lo = jnp.stack(jnp.meshgrid(l[:-1], l[:-1], indexing="ij"), axis=-1)
    g_hi = jnp.stack(jnp.meshgrid(l[1:], l[1:], indexing="ij"), axis=-1)
    g = jnp.stack((g_lo, g_hi), axis=-2).reshape(grid_size * grid_size, 2, 2)
    grid_points = jnp.stack((g, 1.0 - g), axis=-2)                   # (G^2, 2, 2, 2)
    grid_config = jnp.sum(
        patch_config[..., None, None, :, :] * grid_points, axis=-2)  # (..., G^2, 2, 2)
    t = jnp.mean(grid_config, axis=-2, keepdims=True)                # (..., G^2, 1, 2)
    d = (grid_config[..., 1, :] - grid_config[..., 0, :]) / 2.0      # (..., G^2, 2)
    D = d[..., :, None] * jnp.eye(2, dtype=d.dtype)                  # diag_embed
    affine = jnp.concatenate((D, t), axis=-2)                        # (..., G^2, 3, 2)
    sample_grid = jnp.matmul(patch_points, affine[..., None, :, :])  # (..., G^2, P, P, 2)
    return grid_config, sample_grid


def interpolate_pos_encoding(position_embeddings, centers, hidden_size):
    patch_pos = position_embeddings[0, 1:]                           # (num_patches, H)
    k = int(round(patch_pos.shape[0] ** 0.5))
    pp = patch_pos.reshape(k, k, hidden_size).transpose(2, 0, 1)     # (H, k, k)
    bshape = centers.shape[:-1]
    cflat = centers.reshape(-1, 2)
    # grid_sample receives the flipped centers: x <- centers[...,1], y <- centers[...,0]
    Wx = _axis_tap_weights(cflat[:, 1], k)                           # (M, k)
    Wy = _axis_tap_weights(cflat[:, 0], k)                           # (M, k)
    W2d = (Wy[:, :, None] * Wx[:, None, :]).reshape(-1, k * k)       # (M, k*k)
    emb = pp.reshape(hidden_size, k * k) @ W2d.T                     # (H, M)
    # NOTE: the reference reshapes (H, M) directly to bsz + (H,) with NO
    # transpose; reproduced faithfully (verify against the PyTorch checkpoint).
    return emb.reshape(bshape + (hidden_size,))


# --------------------------------------------------------------------------
# Module: params + forward
# --------------------------------------------------------------------------
def init_params(key, image_size, patch_size, num_channels, hidden_size):
    num_patches = (image_size // patch_size) ** 2
    k1, k2, k3, k4 = jax.random.split(key, 4)
    fan_in = num_channels * patch_size * patch_size
    proj_w = jax.random.normal(
        k3, (hidden_size, num_channels, patch_size, patch_size), jnp.float32
    ) / math.sqrt(fan_in)
    return dict(
        cls_token=jax.random.normal(k1, (1, 1, hidden_size), jnp.float32),
        position_embeddings=jax.random.normal(
            k2, (1, num_patches + 1, hidden_size), jnp.float32),
        # Conv2d(kernel=stride=P) as matmul: weight flattened/transposed ONCE at
        # init to (C*P*P, hidden); rows are (c, ph, pw) row-major, which matches
        # the (n, m, c, ph, pw) layout emitted by the sampling einsum, so the
        # kernel input x_flat is a pure reshape (no transpose).
        proj_w_kh=proj_w.reshape(hidden_size, fan_in).T,
        proj_b=jax.random.normal(k4, (hidden_size,), jnp.float32) * 0.01,
        patch_size=patch_size,
        hidden_size=hidden_size,
        num_channels=num_channels,
    )


def ssvit_embeddings_forward(params, pixel_values, patch_config, grid_size,
                             return_pixel_values, out_dtype=jnp.bfloat16):
    P = params["patch_size"]
    Hs = params["hidden_size"]
    C = pixel_values.shape[-3]
    assert C == params["num_channels"]

    patch_points = make_patch_points(P)
    corners, sample_grid = grid_sample_points(patch_config, grid_size, patch_points)

    bsz = pixel_values.shape[:-3]
    nbsz = sample_grid.shape[len(bsz):-3]
    _pixel_values = pixel_values.reshape((-1,) + pixel_values.shape[-3:])
    Nflat = _pixel_values.shape[0]
    _sample_grid = sample_grid.reshape((Nflat, -1) + sample_grid.shape[-3:])

    # Separable bicubic sampling of every patch (exact reference semantics).
    _sp = sample_patches_bicubic(_pixel_values, _sample_grid)   # (Nflat, M_per, C, P, P)
    sample_patches = _sp.reshape(bsz + nbsz + _sp.shape[-3:])

    # Kernel input: pure reshape, no relayout.
    x_flat = _sp.reshape(-1, C * P * P)                         # (M, C*P*P)
    M = x_flat.shape[0]

    centers = (corners[..., 0, :] + corners[..., 1, :]) / 2.0
    pos = interpolate_pos_encoding(params["position_embeddings"], centers, Hs)
    pos_flat = pos.reshape(M, Hs)

    emb_flat = patch_project(x_flat, params["proj_w_kh"], pos_flat,
                             params["proj_b"], out_dtype=out_dtype)  # Pallas kernel
    embeddings = emb_flat.reshape(bsz + nbsz + (Hs,))
    # dropout: identity (eval-mode semantics)
    return corners, embeddings, (sample_patches if return_pixel_values else None)


# --------------------------------------------------------------------------
if __name__ == "__main__":
    image_size, patch_size, num_channels, hidden_size = 16, 4, 3, 32
    B, N, grid_size = 2, 2, 2

    key = jax.random.PRNGKey(0)
    kp, kpix, kpc = jax.random.split(key, 3)
    params = init_params(kp, image_size, patch_size, num_channels, hidden_size)

    pixel_values = jax.random.normal(
        kpix, (B, num_channels, image_size, image_size), jnp.float32)
    patch_config = jax.random.uniform(
        kpc, (B, N, 2, 2), jnp.float32, minval=-1.0, maxval=1.0)

    corners, embeddings, patches = ssvit_embeddings_forward(
        params, pixel_values, patch_config, grid_size, return_pixel_values=True)

    jax.block_until_ready(embeddings)
    G2 = grid_size * grid_size
    assert corners.shape == (B, N, G2, 2, 2)
    assert embeddings.shape == (B, N, G2, hidden_size)
    assert patches.shape == (B, N, G2, num_channels, patch_size, patch_size)
    print("KERNEL_OK")
</pallas_src>

<mosaic_0001>
module attributes {stable_mosaic.version = 11 : i64} {
  func.func @_patch_project_kernel(%arg0: i32, %arg1: memref<16x48xbf16, #tpu.memory_space<vmem>>, %arg2: memref<48x128xbf16, #tpu.memory_space<vmem>>, %arg3: memref<16x128xbf16, #tpu.memory_space<vmem>>, %arg4: memref<1x128xf32, #tpu.memory_space<vmem>>, %arg5: memref<16x128xbf16, #tpu.memory_space<vmem>>) attributes {dimension_semantics = [#tpu.dimension_semantics<parallel>], iteration_bounds = array<i64: 1>, scalar_prefetch = 0 : i64, scratch_operands = 0 : i64, tpu.core_type = #tpu.core_type<tc>, window_params = [{transform_indices = @transform_0, window_bounds = array<i64: 16, 48>}, {pipeline_mode = #tpu.pipeline_mode<synchronous>, transform_indices = @transform_1, window_bounds = array<i64: 48, 128>}, {transform_indices = @transform_2, window_bounds = array<i64: 16, 128>}, {pipeline_mode = #tpu.pipeline_mode<synchronous>, transform_indices = @transform_3, window_bounds = array<i64: 1, 128>}, {transform_indices = @transform_4, window_bounds = array<i64: 16, 128>}]} {
    %c0 = arith.constant 0 : index
    %c0_0 = arith.constant 0 : index
    %0 = vector.load %arg1[%c0, %c0_0] : memref<16x48xbf16, #tpu.memory_space<vmem>>, vector<16x48xbf16>
    %c0_1 = arith.constant 0 : index
    %c0_2 = arith.constant 0 : index
    %1 = vector.load %arg2[%c0_1, %c0_2] : memref<48x128xbf16, #tpu.memory_space<vmem>>, vector<48x128xbf16>
    %cst = arith.constant dense<0.000000e+00> : vector<16x128xf32>
    %2 = tpu.matmul %0, %1, %cst {dimension_numbers = #tpu.dot_dimension_numbers<[1], [0], [0], [1], [0, 0, 1, 1], [], []>} : vector<16x48xbf16>, vector<48x128xbf16>, vector<16x128xf32> -> vector<16x128xf32>
    %c0_3 = arith.constant 0 : index
    %c0_4 = arith.constant 0 : index
    %3 = vector.load %arg3[%c0_3, %c0_4] : memref<16x128xbf16, #tpu.memory_space<vmem>>, vector<16x128xbf16>
    %4 = arith.extf %3 : vector<16x128xbf16> to vector<16x128xf32>
    %5 = arith.addf %2, %4 : vector<16x128xf32>
    %c0_5 = arith.constant 0 : index
    %c0_6 = arith.constant 0 : index
    %6 = vector.load %arg4[%c0_5, %c0_6] : memref<1x128xf32, #tpu.memory_space<vmem>>, vector<1x128xf32>
    %7 = vector.broadcast %6 : vector<1x128xf32> to vector<16x128xf32>
    %8 = arith.addf %5, %7 : vector<16x128xf32>
    %9 = arith.truncf %8 : vector<16x128xf32> to vector<16x128xbf16>
    %c0_7 = arith.constant 0 : index
    %c0_8 = arith.constant 0 : index
    %10 = vector.load %arg5[%c0_7, %c0_8] : memref<16x128xbf16, #tpu.memory_space<vmem>>, vector<16x128xbf16>
    tpu.vector_store %arg5[%c0_7, %c0_8], %9 {strides = array<i32>} : memref<16x128xbf16, #tpu.memory_space<vmem>>, vector<16x128xbf16>,
    return
  }
  func.func @transform_0(%arg0: i32) -> (i32, i32) {
    %c0_i32 = arith.constant 0 : i32
    %c0_i32_0 = arith.constant 0 : i32
    return %arg0, %c0_i32 : i32, i32
  }
  func.func @transform_1(%arg0: i32) -> (i32, i32) {
    %c0_i32 = arith.constant 0 : i32
    %c0_i32_0 = arith.constant 0 : i32
    %c0_i32_1 = arith.constant 0 : i32
    return %c0_i32, %c0_i32_0 : i32, i32
  }
  func.func @transform_2(%arg0: i32) -> (i32, i32) {
    %c0_i32 = arith.constant 0 : i32
    %c0_i32_0 = arith.constant 0 : i32
    return %arg0, %c0_i32 : i32, i32
  }
  func.func @transform_3(%arg0: i32) -> (i32, i32) {
    %c0_i32 = arith.constant 0 : i32
    %c0_i32_0 = arith.constant 0 : i32
    %c0_i32_1 = arith.constant 0 : i32
    return %c0_i32, %c0_i32_0 : i32, i32
  }
  func.func @transform_4(%arg0: i32) -> (i32, i32) {
    %c0_i32 = arith.constant 0 : i32
    %c0_i32_0 = arith.constant 0 : i32
    return %arg0, %c0_i32 : i32, i32
  }
}

</mosaic_0001>

<bundles_post_ra>
// kernel: tpu_custom_call.1
= control target key start
LH: loop header
LB: loop body
LE: loop exit
PB: predicated region body
PF: predicated region fallthrough
CT: control target
= control target key end

     0   :  { %9 = vsyncpa [#allocation3], 0  ;;  %s346_s0 = inlined_call_operand.hbm [shape: bf16[16,48], index: 0, kind: input, shape index: {}]   ;;  %s347_s1 = inlined_call_operand.hbm [shape: bf16[48,128], index: 1, kind: input, shape index: {}]   ;;  %s348_s2 = inlined_call_operand.hbm [shape: bf16[16,128], index: 2, kind: input, shape index: {}]   ;;  %s349_s3 = inlined_call_operand.vmem [shape: f32[1,128], index: 3, kind: input, shape index: {}]   ;;  %s350_s4 = inlined_call_operand.hbm [shape: bf16[16,128], index: 4, kind: output, shape index: {}]  }
   0x1   :  { %10 = vsyncpa [#allocation6], 0 }
   0x2   :  { %11 = vsyncpa [#allocation4], 0  ;;  %s29_s17 = sshll.u32 %s347_s1, 4  ;;  %s288_s18 = smov [#allocation5]   ;;  %s30_s17 = int_to_ptr.hbm [resolvable:$true] %s29_s17 }
   0x3   :  { %s31_s19 = sshll.u32 %s288_s18, 4  ;;  %s16_s22 = sshll.u32 %s346_s0, 4  ;;  %s32_s19 = int_to_ptr.vmem [resolvable:$true] %s31_s19  ;;  %s17_s22 = int_to_ptr.hbm [resolvable:$true] %s16_s22 }
   0x4   :  { %s289_s23 = smov 64   ;;  %s290_s24 = smov 4  }
   0x5   :  { %37 = dma.hbm_to_vmem [thread:$0]  %s30_s17, 384, %s32_s19, [#allocation6], %s289_s23, %s289_s23, %s290_s24  }
   0x6   :  { %s291_s25 = smov [#allocation2]   ;;  %s42_s1 = sshll.u32 %s348_s2, 4  ;;  %s43_s1 = int_to_ptr.hbm [resolvable:$true] %s42_s1 }
   0x7   :  { %s18_s26 = sshll.u32 %s291_s25, 4  ;;  %s292_s0 = smov [#allocation7]   ;;  %s19_s26 = int_to_ptr.vmem [resolvable:$true] %s18_s26 }
   0x8   :  { %24 = dma.hbm_to_vmem [thread:$0]  %s17_s22, 128, %s19_s26, [#allocation3], %s289_s23, %s289_s23, %s290_s24  }
   0x9   :  { %s44_s29 = sshll.u32 %s292_s0, 4  ;;  %s45_s29 = int_to_ptr.vmem [resolvable:$true] %s44_s29 }
   0xa   :  { %50 = dma.hbm_to_vmem [thread:$0]  %s43_s1, 128, %s45_s29, [#allocation6], %s289_s23, %s289_s23, %s290_s24  }
   0xb   :  { %282 = dma.done.wait [#allocation3], 128  }
   0xc   :  { %283 = vsyncadd [#allocation3], 4294967168 }
   0xd   :  { %284 = dma.done.wait [#allocation6], 512  }
   0xe   :  { %285 = vsyncadd [#allocation6], 4294966784  ;;  %v169_v0 = vld [vmem:[#allocation5 + $0x10] sm:$0xff]  ;;  %v168_v1 = vld [vmem:[#allocation5 + $0x8] sm:$0xff]  ;;  %vm101_vm0 = vcmask 392192   ;;  %s293_s5 = smov [#allocation8]  }
   0xf   :  { %110 = vmatpush.bf16.msra.mxu0 %v169_v0  ;;  %v167_v2 = vld [vmem:[#allocation5] sm:$0xff]  ;;  %v166_v3 = vld [vmem:[#allocation2] sm:$0xff]  ;;  %s133_s6 = sshll.u32 %s293_s5, 4  ;;  %s135_s9 = sshll.u32 %s350_s4, 4  ;;  %s134_s6 = int_to_ptr.vmem [resolvable:$true] %s133_s6  ;;  %s136_s9 = int_to_ptr.hbm [resolvable:$true] %s135_s9 }
  0x10   :  { %v171_v4 = vld [vmem:[#allocation7] sm:$0xff]  }
  0x11   :  { %v172_v6 = vunpack.c.l.bf16 %v171_v4  ;;  %v173_v7 = vunpack.c.h.bf16 %v171_v4  ;;  %v185_v9 = vld [vmem:[%s349_s3] ss:$0 sm:$0xff] }
  0x13   :  { %111 = vmatpush.bf16.msra.mxu0 %v168_v1 }
  0x17   :  { %112 = vmatpush.bf16.msra.mxu0 %v167_v2 }
  0x1a   :  { %165 = vmatmul.msk.bf16.vlgmr.msra.gmra.mxu0 %vm101_vm0, %v166_v3 }
  0x97   :  { %v114_v5 = vpop.f32.mrf.mxu0 }
  0x98   :  { %v115_v8 = vadd.f32 %v172_v6, %v114_v5 }
  0x9a   :  { %v123_v12 = vadd.f32 %v185_v9, %v115_v8 }
  0x9f   :  { %v116_v10 = vpop.f32.mrf.mxu0 }
  0xa0   :  { %v117_v11 = vadd.f32 %v173_v7, %v116_v10 }
  0xa2   :  { %v124_v13 = vadd.f32 %v185_v9, %v117_v11 }
  0xa4   :  { %v177_v14 = vpack.c.bf16 %v124_v13, %v123_v12 }
  0xa6   :  { %178 = vst [vmem:[#allocation8] sm:$0xff] %v177_v14  }
  0xa7   :  { %141 = dma.vmem_to_hbm [thread:$0]  %s134_s6, 128, %s136_s9, [#allocation4], %s289_s23, %s289_s23, %s290_s24  }
  0xa8   :  { %286 = dma.done.wait [#allocation4], 128  }
  0xa9   :  { %287 = vsyncadd [#allocation4], 4294967168 }
  0xaa   :  { %146 = vsyncpa [#allocation3], 1 }
  0xab   :  { %147 = vsyncpa [#allocation6], 1 }
  0xac   :  { %148 = vsyncpa [#allocation4], 1 }

</bundles_post_ra>
